<compile_context>
chip_gen: v7x
topology: tpu7x:2x2x1
jax: 0.10.0
libtpu: 0.0.40
codegen_flags: <defaults>
</compile_context>

<pallas_src>
import functools

import jax
import jax.numpy as jnp
from jax.experimental import pallas as pl
from jax.experimental.pallas import tpu as pltpu

INPUT_SIZE = 784
HIDDEN_SIZE = 400
OUT_SIZE = 10

HIDDEN_PAD = 512   # 400 padded up to a multiple of 128 (zero-padded -> same math)
OUT_PAD = 128      # 10 padded up to 128 for lane-dense, unmasked output stores


def _round_up(x: int, m: int) -> int:
    return (x + m - 1) // m * m


def mlp_kernel(x_ref, w1_ref, b1_ref, w2_ref, b2_ref, o_ref):
    # fc1 + ReLU (bf16 inputs, f32 MXU accumulation)
    h = jnp.dot(x_ref[...], w1_ref[...], preferred_element_type=jnp.float32)
    h = jnp.maximum(h + b1_ref[...], 0.0)
    # fc2 + ReLU (feed bf16 back into the MXU, accumulate f32)
    o = jnp.dot(h.astype(jnp.bfloat16), w2_ref[...], preferred_element_type=jnp.float32)
    o = jnp.maximum(o + b2_ref[...], 0.0)
    o_ref[...] = o.astype(o_ref.dtype)


@functools.partial(jax.jit, static_argnames=("tile_b",))
def mlp_forward(x, w1_p, b1_p, w2_p, b2_p, *, tile_b: int = 256):
    """Fused MLP forward.

    x:    [B, 784]            (any float dtype; cast to bf16 internally)
    w1_p: [784, HIDDEN_PAD]   bf16, zero-padded cols 400..511
    b1_p: [1, HIDDEN_PAD]     f32,  zero-padded
    w2_p: [HIDDEN_PAD, OUT_PAD] bf16, zero-padded rows/cols
    b2_p: [1, OUT_PAD]        f32,  zero-padded
    returns [B, 10] f32
    """
    B = x.shape[0]
    # Batch tile: multiple of 8 sublanes, capped at tile_b.
    tb = min(tile_b, _round_up(B, 8))
    b_pad = _round_up(B, tb)

    x = x.astype(jnp.bfloat16)
    if b_pad != B:
        x = jnp.pad(x, ((0, b_pad - B), (0, 0)))

    grid = (b_pad // tb,)

    out_padded = pl.pallas_call(
        mlp_kernel,
        out_shape=jax.ShapeDtypeStruct((b_pad, OUT_PAD), jnp.float32),
        grid=grid,
        in_specs=[
            # Activations: one batch tile per grid step.
            pl.BlockSpec((tb, INPUT_SIZE), lambda i: (i, 0)),
            # Weights / biases: constant index_map -> loaded once, VMEM-resident.
            pl.BlockSpec((INPUT_SIZE, HIDDEN_PAD), lambda i: (0, 0)),
            pl.BlockSpec((1, HIDDEN_PAD), lambda i: (0, 0)),
            pl.BlockSpec((HIDDEN_PAD, OUT_PAD), lambda i: (0, 0)),
            pl.BlockSpec((1, OUT_PAD), lambda i: (0, 0)),
        ],
        out_specs=pl.BlockSpec((tb, OUT_PAD), lambda i: (i, 0)),
        compiler_params=pltpu.CompilerParams(
            dimension_semantics=("parallel",),   # batch tiles shard across TCs (v7x)
            vmem_limit_bytes=16 << 20,           # modest; live data is only a few MiB
        ),
    )(x, w1_p, b1_p, w2_p, b2_p)

    # Strip batch padding and the 10->128 output lane padding.
    return out_padded[:B, :OUT_SIZE]


def init_params(key):
    """Deterministic init mimicking nn.Linear default (uniform +- 1/sqrt(fan_in)).

    Returned unpadded, stored pre-transposed relative to PyTorch: [in, out]."""
    k1, k2, k3, k4 = jax.random.split(key, 4)
    bound1 = 1.0 / jnp.sqrt(jnp.float32(INPUT_SIZE))
    bound2 = 1.0 / jnp.sqrt(jnp.float32(HIDDEN_SIZE))
    w1_t = jax.random.uniform(k1, (INPUT_SIZE, HIDDEN_SIZE), jnp.float32, -bound1, bound1)
    b1 = jax.random.uniform(k2, (HIDDEN_SIZE,), jnp.float32, -bound1, bound1)
    w2_t = jax.random.uniform(k3, (HIDDEN_SIZE, OUT_SIZE), jnp.float32, -bound2, bound2)
    b2 = jax.random.uniform(k4, (OUT_SIZE,), jnp.float32, -bound2, bound2)
    return w1_t, b1, w2_t, b2


def prepare_params(w1_t, b1, w2_t, b2):
    """Zero-pad to lane-aligned shapes and cast weights to bf16 (biases stay f32)."""
    w1_p = jnp.zeros((INPUT_SIZE, HIDDEN_PAD), jnp.bfloat16).at[:, :HIDDEN_SIZE].set(
        w1_t.astype(jnp.bfloat16))
    b1_p = jnp.zeros((1, HIDDEN_PAD), jnp.float32).at[0, :HIDDEN_SIZE].set(b1)
    w2_p = jnp.zeros((HIDDEN_PAD, OUT_PAD), jnp.bfloat16).at[:HIDDEN_SIZE, :OUT_SIZE].set(
        w2_t.astype(jnp.bfloat16))
    b2_p = jnp.zeros((1, OUT_PAD), jnp.float32).at[0, :OUT_SIZE].set(b2)
    return w1_p, b1_p, w2_p, b2_p


if __name__ == "__main__":
    key = jax.random.PRNGKey(0)
    kx, kp = jax.random.split(key)

    batch = 16  # small test batch; tile_b=8 below exercises a 2-step batch grid
    x = jax.random.normal(kx, (batch, INPUT_SIZE), jnp.float32)
    w1_t, b1, w2_t, b2 = init_params(kp)
    w1_p, b1_p, w2_p, b2_p = prepare_params(w1_t, b1, w2_t, b2)

    out = mlp_forward(x, w1_p, b1_p, w2_p, b2_p, tile_b=8)
    out = jax.block_until_ready(out)
    assert out.shape == (batch, OUT_SIZE)

    # Pure-JAX reference following the exact same dtype path (bf16 inputs, f32 acc).
    xb = x.astype(jnp.bfloat16)
    h_ref = jnp.maximum(
        jnp.dot(xb, w1_p, preferred_element_type=jnp.float32) + b1_p, 0.0)
    o_ref = jnp.maximum(
        jnp.dot(h_ref.astype(jnp.bfloat16), w2_p, preferred_element_type=jnp.float32)
        + b2_p, 0.0)[:, :OUT_SIZE]
    assert jnp.allclose(out, o_ref, atol=1e-3, rtol=1e-3)

    # Loose sanity check against the unpadded f32 math (bf16 quantization error only).
    ref_f32 = jnp.maximum(
        jnp.maximum(x @ w1_t + b1, 0.0) @ w2_t + b2, 0.0)
    assert jnp.allclose(out, ref_f32, atol=5e-2, rtol=5e-2)

    print("KERNEL_OK")
</pallas_src>

<mosaic_0001>
module attributes {stable_mosaic.version = 11 : i64} {
  func.func @mlp_kernel(%arg0: i32, %arg1: memref<8x784xbf16, #tpu.memory_space<vmem>>, %arg2: memref<784x512xbf16, #tpu.memory_space<vmem>>, %arg3: memref<1x512xf32, #tpu.memory_space<vmem>>, %arg4: memref<512x128xbf16, #tpu.memory_space<vmem>>, %arg5: memref<1x128xf32, #tpu.memory_space<vmem>>, %arg6: memref<8x128xf32, #tpu.memory_space<vmem>>) attributes {dimension_semantics = [#tpu.dimension_semantics<parallel>], iteration_bounds = array<i64: 2>, scalar_prefetch = 0 : i64, scratch_operands = 0 : i64, tpu.core_type = #tpu.core_type<tc>, window_params = [{transform_indices = @transform_0, window_bounds = array<i64: 8, 784>}, {pipeline_mode = #tpu.pipeline_mode<synchronous>, transform_indices = @transform_1, window_bounds = array<i64: 784, 512>}, {pipeline_mode = #tpu.pipeline_mode<synchronous>, transform_indices = @transform_2, window_bounds = array<i64: 1, 512>}, {pipeline_mode = #tpu.pipeline_mode<synchronous>, transform_indices = @transform_3, window_bounds = array<i64: 512, 128>}, {pipeline_mode = #tpu.pipeline_mode<synchronous>, transform_indices = @transform_4, window_bounds = array<i64: 1, 128>}, {transform_indices = @transform_5, window_bounds = array<i64: 8, 128>}]} {
    %c0 = arith.constant 0 : index
    %c0_0 = arith.constant 0 : index
    %0 = vector.load %arg1[%c0, %c0_0] : memref<8x784xbf16, #tpu.memory_space<vmem>>, vector<8x784xbf16>
    %c0_1 = arith.constant 0 : index
    %c0_2 = arith.constant 0 : index
    %1 = vector.load %arg2[%c0_1, %c0_2] : memref<784x512xbf16, #tpu.memory_space<vmem>>, vector<784x512xbf16>
    %cst = arith.constant dense<0.000000e+00> : vector<8x512xf32>
    %2 = tpu.matmul %0, %1, %cst {dimension_numbers = #tpu.dot_dimension_numbers<[1], [0], [0], [1], [0, 0, 1, 1], [], []>} : vector<8x784xbf16>, vector<784x512xbf16>, vector<8x512xf32> -> vector<8x512xf32>
    %c0_3 = arith.constant 0 : index
    %c0_4 = arith.constant 0 : index
    %3 = vector.load %arg3[%c0_3, %c0_4] : memref<1x512xf32, #tpu.memory_space<vmem>>, vector<1x512xf32>
    %4 = vector.broadcast %3 : vector<1x512xf32> to vector<8x512xf32>
    %5 = arith.addf %2, %4 : vector<8x512xf32>
    %cst_5 = arith.constant 0.000000e+00 : f32
    %6 = vector.broadcast %cst_5 : f32 to vector<8x512xf32>
    %7 = arith.maximumf %5, %6 : vector<8x512xf32>
    %8 = arith.truncf %7 : vector<8x512xf32> to vector<8x512xbf16>
    %c0_6 = arith.constant 0 : index
    %c0_7 = arith.constant 0 : index
    %9 = vector.load %arg4[%c0_6, %c0_7] : memref<512x128xbf16, #tpu.memory_space<vmem>>, vector<512x128xbf16>
    %cst_8 = arith.constant dense<0.000000e+00> : vector<8x128xf32>
    %10 = tpu.matmul %8, %9, %cst_8 {dimension_numbers = #tpu.dot_dimension_numbers<[1], [0], [0], [1], [0, 0, 1, 1], [], []>} : vector<8x512xbf16>, vector<512x128xbf16>, vector<8x128xf32> -> vector<8x128xf32>
    %c0_9 = arith.constant 0 : index
    %c0_10 = arith.constant 0 : index
    %11 = vector.load %arg5[%c0_9, %c0_10] : memref<1x128xf32, #tpu.memory_space<vmem>>, vector<1x128xf32>
    %12 = vector.broadcast %11 : vector<1x128xf32> to vector<8x128xf32>
    %13 = arith.addf %10, %12 : vector<8x128xf32>
    %cst_11 = arith.constant 0.000000e+00 : f32
    %14 = vector.broadcast %cst_11 : f32 to vector<8x128xf32>
    %15 = arith.maximumf %13, %14 : vector<8x128xf32>
    %c0_12 = arith.constant 0 : index
    %c0_13 = arith.constant 0 : index
    %16 = vector.load %arg6[%c0_12, %c0_13] : memref<8x128xf32, #tpu.memory_space<vmem>>, vector<8x128xf32>
    tpu.vector_store %arg6[%c0_12, %c0_13], %15 {strides = array<i32>} : memref<8x128xf32, #tpu.memory_space<vmem>>, vector<8x128xf32>,
    return
  }
  func.func @transform_0(%arg0: i32) -> (i32, i32) {
    %c0_i32 = arith.constant 0 : i32
    %c0_i32_0 = arith.constant 0 : i32
    return %arg0, %c0_i32 : i32, i32
  }
  func.func @transform_1(%arg0: i32) -> (i32, i32) {
    %c0_i32 = arith.constant 0 : i32
    %c0_i32_0 = arith.constant 0 : i32
    %c0_i32_1 = arith.constant 0 : i32
    return %c0_i32, %c0_i32_0 : i32, i32
  }
  func.func @transform_2(%arg0: i32) -> (i32, i32) {
    %c0_i32 = arith.constant 0 : i32
    %c0_i32_0 = arith.constant 0 : i32
    %c0_i32_1 = arith.constant 0 : i32
    return %c0_i32, %c0_i32_0 : i32, i32
  }
  func.func @transform_3(%arg0: i32) -> (i32, i32) {
    %c0_i32 = arith.constant 0 : i32
    %c0_i32_0 = arith.constant 0 : i32
    %c0_i32_1 = arith.constant 0 : i32
    return %c0_i32, %c0_i32_0 : i32, i32
  }
  func.func @transform_4(%arg0: i32) -> (i32, i32) {
    %c0_i32 = arith.constant 0 : i32
    %c0_i32_0 = arith.constant 0 : i32
    %c0_i32_1 = arith.constant 0 : i32
    return %c0_i32, %c0_i32_0 : i32, i32
  }
  func.func @transform_5(%arg0: i32) -> (i32, i32) {
    %c0_i32 = arith.constant 0 : i32
    %c0_i32_0 = arith.constant 0 : i32
    return %arg0, %c0_i32 : i32, i32
  }
}

</mosaic_0001>

<bundles_post_ra>
// kernel: mlp_forward.1
= control target key start
LH: loop header
LB: loop body
LE: loop exit
PB: predicated region body
PF: predicated region fallthrough
CT: control target
= control target key end

     0   :  { %10 = vsyncpa [#allocation3], 0  ;;  %s3345_s0 = inlined_call_operand.vmem [shape: bf16[16,784], index: 0, kind: input, shape index: {}]   ;;  %s3346_s1 = inlined_call_operand.hbm [shape: bf16[784,512], index: 1, kind: input, shape index: {}]   ;;  %s3347_s2 = inlined_call_operand.vmem [shape: f32[1,512], index: 2, kind: input, shape index: {}]   ;;  %s3348_s3 = inlined_call_operand.hbm [shape: bf16[512,128], index: 3, kind: input, shape index: {}]   ;;  %s3349_s4 = inlined_call_operand.vmem [shape: f32[1,128], index: 4, kind: input, shape index: {}]   ;;  %s3350_s5 = inlined_call_operand.hbm [shape: f32[16,128], index: 5, kind: output, shape index: {}]  }
   0x1   :  { %11 = vsyncpa [#allocation6], 0 }
   0x2   :  { %12 = vsyncpa [#allocation4], 0 }
   0x3   :  { %14 = vsyncpa [#allocation4 + $0x1], 0  ;;  %s3149_s18 = smov 0   ;;  %s3151_s19 = smov 0  }
   0x4   :  { %s3153_s20 = smov 0   ;;  %s3155_s21 = smov 0  }
   0x5 LB: > { %s3170_s22 = sadd.s32 4294967295, %s3109_s21   ;;  %s2260_s23 = sadd.s32 4294967294, %s3109_s21   ;;  %s3109_s21 = sphi %s3155_s21, %s3368_s21   ;;  %s3105_s20 = sphi %s3153_s20, %s3367_s20   ;;  %s3101_s19 = sphi %s3151_s19, %s3366_s19   ;;  %s3097_s18 = sphi %s3149_s18, %s3365_s18  }
   0x6   : > { %s3174_s24 = sadd.s32 1, %s3109_s21   ;;  %s137_s25 = sadd.s32 1, %s3105_s20 }
   0x7   : > { %s134_s26 = ssub.s32 %s3109_s21, %s3174_s24  ;;  %p147_p0 = scmp.ne.s32.totalorder %s3105_s20, %s3101_s19 }
   0x8   : > { %p135_p1 = scmp.eq.s32.totalorder %s134_s26, 0  ;;  %p148_p2 = scmp.eq.s32.totalorder %s3170_s22, 1 }
   0x9   : > { %p153_p3 = scmp.ne.s32.totalorder %s3101_s19, %s3097_s18  ;;  %p154_p4 = scmp.eq.s32.totalorder %s2260_s23, 1 }
   0xa   : > { %s3185_s27 = scalar_select %p135_p1, %s3105_s20, %s137_s25  }
   0xb   : > { %p3187_p5 = por %p148_p2, %p147_p0  ;;  %p3191_p6 = por %p154_p4, %p153_p3 }
   0xc   : > { %p2261_p7 = scmp.ge.s32.totalorder %s3109_s21, 1  ;;  %p161_p8 = scmp.lt.s32.totalorder %s3109_s21, 3 }
   0xd   : > { %s3354_s28 = scalar_select %p3187_p5, 1, 0 }
   0xe   : > { %s3355_s29 = scalar_select %p3191_p6, 1, 0 }
   0xf   : > { %p3351_p9 = scmp.eq.s32.totalorder %s3170_s22, 0  ;;  %p3198_p10 = pnand %p2261_p7, %p161_p8 }
  0x10   : > { %s3111_s6 = smov [#allocation2]   ;;  %s3112_s9 = smov [#allocation5]  }
  0x11   : > { %s3356_s30 = scalar_select %p3198_p10, 1, 0 }
  0x12   : > { %s173_s7 = sshll.u32 %s3111_s6, 4  ;;  %p2595_p11 = pneg %p3198_p10  ;;  %s174_s7 = int_to_ptr.vmem [resolvable:$true] %s173_s7 }
  0x13   : > { %s189_s10 = sshll.u32 %s3112_s9, 4  ;;  %s2983_s13 = scalar_lea.hbm %s3346_s1, 25088  ;;  %s3210_s10 = int_to_ptr.vmem [resolvable:$true] %s189_s10 }
  0x14   : > { %p3206_p12 = pnand %p3351_p9, %p2595_p11  ;;  %p2984_p13 = scmp.ne.s32.totalorder %s3346_s1, %s2983_s13 }
  0x15   : > { %p2990_p3 = scmp.lt.u32.totalorder %s2983_s13, %s3346_s1 }
  0x16   : > { %p2985_p0 = pneg %p3206_p12 }
  0x18   : > { %p2986_p1 = pnand %p2985_p0, %p2984_p13 }
  0x1a   : > { %p2987_p2 = pneg %p2986_p1 }
  0x1c   : > { %p2992_p4 = pnand %p2990_p3, %p2987_p2 }
  0x1e   : > { %2995 = shalt.err (!%p2992_p4)
}
  0x1f   : > { %s2996_s23 = scalar_lea.vmem %s174_s7, 25088  ;;  %p3004_p9 = scmp.lt.s32.totalorder %s174_s7, %s174_s7 }
  0x20   : > { %p2997_p7 = scmp.ne.s32.totalorder %s174_s7, %s2996_s23  ;;  %p3005_p6 = scmp.lt.s32.totalorder %s2996_s23, %s2996_s23 }
  0x22   : > { %p2999_p8 = pnand %p2997_p7, %p2985_p0  ;;  %p3006_p5 = por %p3005_p6, %p3004_p9 }
  0x24   : > { %p3000_p11 = pneg %p2999_p8 }
  0x26   : > { %p3007_p10 = pnand %p3006_p5, %p3000_p11 }
  0x28   : > { %3010 = shalt.err (!%p3007_p10)
}
  0x29   : > { %s3113_s25 = smov 256   ;;  %s3114_s26 = smov 16  }
  0x2a   : > { %2598 = dma.hbm_to_vmem [thread:$0]  (!%p3206_p12), %s3346_s1, 25088, %s174_s7, [#allocation3], %s3113_s25, %s3113_s25, %s3114_s26  }
  0x2b   : > { %s3011_s13 = scalar_lea.hbm %s3348_s3, 4096 }
  0x2c   : > { %p3012_p13 = scmp.ne.s32.totalorder %s3348_s3, %s3011_s13  ;;  %p3018_p9 = scmp.lt.u32.totalorder %s3011_s13, %s3348_s3 }
  0x2e   : > { %p3014_p5 = pnand %p3012_p13, %p2985_p0 }
  0x30   : > { %p3015_p6 = pneg %p3014_p5 }
  0x32   : > { %p3020_p10 = pnand %p3018_p9, %p3015_p6 }
  0x34   : > { %3023 = shalt.err (!%p3020_p10)
}
  0x35   : > { %s3024_s7 = scalar_lea.vmem %s3210_s10, 4096  ;;  %p3032_p4 = scmp.lt.s32.totalorder %s3210_s10, %s3210_s10 }
  0x36   : > { %p3025_p1 = scmp.ne.s32.totalorder %s3210_s10, %s3024_s7  ;;  %p3033_p7 = scmp.lt.s32.totalorder %s3024_s7, %s3024_s7 }
  0x38   : > { %p3027_p2 = pnand %p3025_p1, %p2985_p0  ;;  %p3034_p8 = por %p3033_p7, %p3032_p4 }
  0x3a   : > { %p3028_p3 = pneg %p3027_p2 }
  0x3c   : > { %p3035_p11 = pnand %p3034_p8, %p3028_p3 }
  0x3e   : > { %3038 = shalt.err (!%p3035_p11)
}
  0x3f   : > { %s3115_s23 = smov 64   ;;  %s3116_s25 = smov 4  }
  0x40   : > { %2601 = dma.hbm_to_vmem [thread:$0]  (!%p3206_p12), %s3348_s3, 4096, %s3210_s10, [#allocation6], %s3115_s23, %s3115_s23, %s3116_s25  }
  0x41   : > { %p3358_p13 = scmp.ne.s32.totalorder %s3356_s30, 0 }
  0x42   : > { %p3359_p0 = scmp.eq.s32.totalorder (!%p3358_p13), %s3170_s22, 0 }
  0x43   : > { %216 = sbr.rel (%p3358_p13) target bundleno = 738 (0x2e2), region = 40 }
  0x4a   : > { %3084 = dma.done.wait (%p3359_p0), [#allocation3], 25088   ;;  %p3360_p5 = pmov %p3359_p0 }
  0x4b   : > { %p3361_p6 = pmov %p3359_p0 }
  0x4c   : > { %3086 = vsyncadd (%p3360_p5), [#allocation3], 4294942208 }
  0x4d   : > { %3088 = dma.done.wait (%p3361_p6), [#allocation6], 4096   ;;  %p3362_p9 = pmov %p3359_p0 }
  0x4e   : > { %v2650_v0 = vld [vmem:[#allocation2 + $0x4] ss:$16 sps:$4 sm:$0xff]   ;;  %v2652_v1 = vld [vmem:[#allocation2 + $0xc] ss:$16 sps:$4 sm:$0xff]   ;;  %v2654_v2 = vld [vmem:[#allocation2] ss:$16 sps:$4 sm:$0xff]  }
  0x4f   : > { %3090 = vsyncadd (%p3362_p9), [#allocation6], 4294963200  ;;  %1484 = vmatprep.subr.bf16.mxu0 %v2650_v0  ;;  %v2655_v3 = vld [vmem:[#allocation2 + $0x8] ss:$16 sps:$4 sm:$0xff]   ;;  %1648 = vmatprep.subr.bf16.mxu1 %v2652_v1  ;;  %v2656_v4 = vld [vmem:[#allocation2 + $0x24] ss:$16 sps:$4 sm:$0xff]  }
  0x50   : > { %1485 = vmatpush1.bf16.msra.mxu0 %v2654_v2  ;;  %1649 = vmatpush1.bf16.msra.mxu1 %v2655_v3  ;;  %v2658_v5 = vld [vmem:[#allocation2 + $0x2c] ss:$16 sps:$4 sm:$0xff]   ;;  %v2660_v6 = vld [vmem:[#allocation2 + $0x20] ss:$16 sps:$4 sm:$0xff]   ;;  %v2661_v7 = vld [vmem:[#allocation2 + $0x28] ss:$16 sps:$4 sm:$0xff]  }
  0x51   : > { %1486 = vmatprep.subr.bf16.mxu0 %v2656_v4  ;;  %1650 = vmatprep.subr.bf16.mxu1 %v2658_v5  ;;  %v2662_v8 = vld [vmem:[#allocation2 + $0x44] ss:$16 sps:$4 sm:$0xff]   ;;  %v2664_v9 = vld [vmem:[#allocation2 + $0x4c] ss:$16 sps:$4 sm:$0xff]   ;;  %v2666_v10 = vld [vmem:[#allocation2 + $0x40] ss:$16 sps:$4 sm:$0xff]  }
  0x52   : > { %v2667_v11 = vld [vmem:[#allocation2 + $0x48] ss:$16 sps:$4 sm:$0xff]   ;;  %v2668_v12 = vld [vmem:[#allocation2 + $0x64] ss:$16 sps:$4 sm:$0xff]   ;;  %v2670_v13 = vld [vmem:[#allocation2 + $0x6c] ss:$16 sps:$4 sm:$0xff]  }
  0x53   : > { %v2672_v14 = vld [vmem:[#allocation2 + $0x60] ss:$16 sps:$4 sm:$0xff]   ;;  %v2673_v15 = vld [vmem:[#allocation2 + $0x68] ss:$16 sps:$4 sm:$0xff]   ;;  %v2674_v16 = vld [vmem:[#allocation2 + $0x84] ss:$16 sps:$4 sm:$0xff]  }
  0x54   : > { %1487 = vmatpush1.bf16.msra.mxu0 %v2660_v6  ;;  %1651 = vmatpush1.bf16.msra.mxu1 %v2661_v7  ;;  %v2676_v17 = vld [vmem:[#allocation2 + $0x8c] ss:$16 sps:$4 sm:$0xff]   ;;  %v2678_v18 = vld [vmem:[#allocation2 + $0x80] ss:$16 sps:$4 sm:$0xff]   ;;  %v2679_v19 = vld [vmem:[#allocation2 + $0x88] ss:$16 sps:$4 sm:$0xff]  }
  0x55   : > { %1488 = vmatprep.subr.bf16.mxu0 %v2662_v8  ;;  %1652 = vmatprep.subr.bf16.mxu1 %v2664_v9  ;;  %v2680_v20 = vld [vmem:[#allocation2 + $0xa4] ss:$16 sps:$4 sm:$0xff]   ;;  %v2682_v21 = vld [vmem:[#allocation2 + $0xac] ss:$16 sps:$4 sm:$0xff]   ;;  %v2684_v22 = vld [vmem:[#allocation2 + $0xa0] ss:$16 sps:$4 sm:$0xff]  }
  0x56   : > { %v2685_v23 = vld [vmem:[#allocation2 + $0xa8] ss:$16 sps:$4 sm:$0xff]   ;;  %v2686_v24 = vld [vmem:[#allocation2 + $0xc4] ss:$16 sps:$4 sm:$0xff]   ;;  %v2688_v25 = vld [vmem:[#allocation2 + $0xcc] ss:$16 sps:$4 sm:$0xff]  }
  0x57   : > { %v2690_v26 = vld [vmem:[#allocation2 + $0xc0] ss:$16 sps:$4 sm:$0xff]   ;;  %v2691_v27 = vld [vmem:[#allocation2 + $0xc8] ss:$16 sps:$4 sm:$0xff]   ;;  %v2692_v28 = vld [vmem:[#allocation2 + $0xe4] ss:$16 sps:$4 sm:$0xff]  }
  0x58   : > { %1489 = vmatpush1.bf16.msra.mxu0 %v2666_v10  ;;  %1653 = vmatpush1.bf16.msra.mxu1 %v2667_v11  ;;  %v2694_v29 = vld [vmem:[#allocation2 + $0xec] ss:$16 sps:$4 sm:$0xff]   ;;  %v2696_v30 = vld [vmem:[#allocation2 + $0xe0] ss:$16 sps:$4 sm:$0xff]   ;;  %p248_p12 = scmp.lt.s32.totalorder %s3170_s22, 1  ;;  %vm1480_vm0 = vcmask 130048  }
  0x59   : > { %1490 = vmatprep.subr.bf16.mxu0 %v2668_v12  ;;  %1654 = vmatprep.subr.bf16.mxu1 %v2670_v13  ;;  %v2697_v31 = vld [vmem:[#allocation2 + $0xe8] ss:$16 sps:$4 sm:$0xff]   ;;  %v2698_v32 = vld [vmem:[#allocation2 + $0x104] ss:$16 sps:$4 sm:$0xff]   ;;  %v2700_v33 = vld [vmem:[#allocation2 + $0x10c] ss:$16 sps:$4 sm:$0xff]  }
  0x5a   : > { %v2702_v34 = vld [vmem:[#allocation2 + $0x100] ss:$16 sps:$4 sm:$0xff]   ;;  %v2703_v35 = vld [vmem:[#allocation2 + $0x108] ss:$16 sps:$4 sm:$0xff]   ;;  %s249_s30 = scalar_select %p248_p12, %s3170_s22, 1 }
  0x5b   : > { %v2704_v36 = vld [vmem:[#allocation2 + $0x124] ss:$16 sps:$4 sm:$0xff]   ;;  %v2706_v37 = vld [vmem:[#allocation2 + $0x12c] ss:$16 sps:$4 sm:$0xff]   ;;  %v2708_v38 = vld [vmem:[#allocation2 + $0x120] ss:$16 sps:$4 sm:$0xff]  }
  0x5c   : > { %1491 = vmatpush1.bf16.msra.mxu0 %v2672_v14  ;;  %1655 = vmatpush1.bf16.msra.mxu1 %v2673_v15  ;;  %s2584_s8 = smul.u32 28, %s249_s30  ;;  %v2709_v39 = vld [vmem:[#allocation2 + $0x128] ss:$16 sps:$4 sm:$0xff]   ;;  %v2710_v40 = vld [vmem:[#allocation2 + $0x144] ss:$16 sps:$4 sm:$0xff]   ;;  %s245_s14 = sand.u32 1, %s3101_s19  }
  0x5d   : > { %1492 = vmatprep.subr.bf16.mxu0 %v2674_v16  ;;  %1656 = vmatprep.subr.bf16.mxu1 %v2676_v17  ;;  %v2712_v41 = vld [vmem:[#allocation2 + $0x14c] ss:$16 sps:$4 sm:$0xff]   ;;  %v2714_v42 = vld [vmem:[#allocation2 + $0x140] ss:$16 sps:$4 sm:$0xff]   ;;  %v2715_v43 = vld [vmem:[#allocation2 + $0x148] ss:$16 sps:$4 sm:$0xff]  }
  0x5e   : > { %s3274_s11 = scalar_lea.vmem %s3345_s0, %s2584_s8  ;;  %v2716_v44 = vld [vmem:[#allocation2 + $0x164] ss:$16 sps:$4 sm:$0xff]   ;;  %v2718_v45 = vld [vmem:[#allocation2 + $0x16c] ss:$16 sps:$4 sm:$0xff]   ;;  %v2720_v47 = vld [vmem:[#allocation2 + $0x160] ss:$16 sps:$4 sm:$0xff]  }
  0x5f   : > { %v254_v46 = vld [vmem:[%s3274_s11] sm:$0xff]  ;;  %v2722_v50 = vld [vmem:[#allocation2 + $0x184] ss:$16 sps:$4 sm:$0xff]   ;;  %v2726_v52 = vld [vmem:[#allocation2 + $0x180] ss:$16 sps:$4 sm:$0xff]   ;;  %s2268_s15 = sshll.u32 %s245_s14, 3 }
  0x60   : > { %1493 = vmatpush1.bf16.msra.mxu0 %v2678_v18  ;;  %1657 = vmatpush1.bf16.msra.mxu1 %v2679_v19  ;;  %v2271_v48 = vcombine.high %v254_v46, %v254_v46  ;;  %v2721_v49 = vld [vmem:[#allocation2 + $0x168] ss:$16 sps:$4 sm:$0xff]   ;;  %v2724_v51 = vld [vmem:[#allocation2 + $0x18c] ss:$16 sps:$4 sm:$0xff]   ;;  %v2728_v54 = vld [vmem:[#allocation2 + $0x1a4] ss:$16 sps:$4 sm:$0xff]   ;;  %v2270_v4 = vcombine.low %v254_v46, %v254_v46 }
  0x61   : > { %1494 = vmatprep.subr.bf16.mxu0 %v2680_v20  ;;  %1658 = vmatprep.subr.bf16.mxu1 %v2682_v21  ;;  %v2727_v53 = vld [vmem:[#allocation2 + $0x188] ss:$16 sps:$4 sm:$0xff]   ;;  %v2730_v55 = vld [vmem:[#allocation2 + $0x1ac] ss:$16 sps:$4 sm:$0xff]   ;;  %v2732_v56 = vld [vmem:[#allocation2 + $0x1a0] ss:$16 sps:$4 sm:$0xff]  }
  0x62   : > { %1516 = vmatprep.mubr.bf16.mxu0 %v2271_v48  ;;  %1680 = vmatprep.mubr.bf16.mxu1 %v2271_v48  ;;  %v2733_v57 = vld [vmem:[#allocation2 + $0x1a8] ss:$16 sps:$4 sm:$0xff]   ;;  %v2734_v58 = vld [vmem:[#allocation2 + $0x1c4] ss:$16 sps:$4 sm:$0xff]   ;;  %v2736_v59 = vld [vmem:[#allocation2 + $0x1cc] ss:$16 sps:$4 sm:$0xff]  }
  0x63   : > { %v2738_v60 = vld [vmem:[#allocation2 + $0x1c0] ss:$16 sps:$4 sm:$0xff]   ;;  %v2739_v61 = vld [vmem:[#allocation2 + $0x1c8] ss:$16 sps:$4 sm:$0xff]   ;;  %v2740_v62 = vld [vmem:[#allocation2 + $0x1e4] ss:$16 sps:$4 sm:$0xff]  }
  0x64   : > { %1495 = vmatpush1.bf16.msra.mxu0 %v2684_v22  ;;  %1659 = vmatpush1.bf16.msra.mxu1 %v2685_v23  ;;  %v2742_v63 = vld [vmem:[#allocation2 + $0x1ec] ss:$16 sps:$4 sm:$0xff]   ;;  %v2744_v0 = vld [vmem:[#allocation2 + $0x1e0] ss:$16 sps:$4 sm:$0xff]   ;;  %v2745_v1 = vld [vmem:[#allocation2 + $0x1e8] ss:$16 sps:$4 sm:$0xff]  }
  0x65   : > { %1496 = vmatprep.subr.bf16.mxu0 %v2686_v24  ;;  %1660 = vmatprep.subr.bf16.mxu1 %v2688_v25  ;;  %v2751_v2 = vld [vmem:[#allocation2 + $0x204] ss:$16 sps:$4 sm:$0xff]   ;;  %v2754_v3 = vld [vmem:[#allocation2 + $0x20c] ss:$16 sps:$4 sm:$0xff]   ;;  %v2749_v5 = vld [vmem:[#allocation2 + $0x200] ss:$16 sps:$4 sm:$0xff]  }
  0x66   : > { %v2752_v6 = vld [vmem:[#allocation2 + $0x208] ss:$16 sps:$4 sm:$0xff]   ;;  %v2757_v7 = vld [vmem:[#allocation2 + $0x224] ss:$16 sps:$4 sm:$0xff]   ;;  %v2760_v8 = vld [vmem:[#allocation2 + $0x22c] ss:$16 sps:$4 sm:$0xff]  }
  0x67   : > { %v2755_v9 = vld [vmem:[#allocation2 + $0x220] ss:$16 sps:$4 sm:$0xff]   ;;  %v2758_v10 = vld [vmem:[#allocation2 + $0x228] ss:$16 sps:$4 sm:$0xff]   ;;  %v2763_v11 = vld [vmem:[#allocation2 + $0x244] ss:$16 sps:$4 sm:$0xff]  }
  0x68   : > { %1497 = vmatpush1.bf16.msra.mxu0 %v2690_v26  ;;  %1661 = vmatpush1.bf16.msra.mxu1 %v2691_v27  ;;  %v2766_v12 = vld [vmem:[#allocation2 + $0x24c] ss:$16 sps:$4 sm:$0xff]   ;;  %v2761_v13 = vld [vmem:[#allocation2 + $0x240] ss:$16 sps:$4 sm:$0xff]   ;;  %v2764_v14 = vld [vmem:[#allocation2 + $0x248] ss:$16 sps:$4 sm:$0xff]  }
  0x69   : > { %1498 = vmatprep.subr.bf16.mxu0 %v2692_v28  ;;  %1662 = vmatprep.subr.bf16.mxu1 %v2694_v29  ;;  %v2769_v15 = vld [vmem:[#allocation2 + $0x264] ss:$16 sps:$4 sm:$0xff]   ;;  %v2772_v16 = vld [vmem:[#allocation2 + $0x26c] ss:$16 sps:$4 sm:$0xff]   ;;  %v2767_v17 = vld [vmem:[#allocation2 + $0x260] ss:$16 sps:$4 sm:$0xff]  }
  0x6a   : > { %v2770_v18 = vld [vmem:[#allocation2 + $0x268] ss:$16 sps:$4 sm:$0xff]   ;;  %v2775_v19 = vld [vmem:[#allocation2 + $0x284] ss:$16 sps:$4 sm:$0xff]   ;;  %v2778_v20 = vld [vmem:[#allocation2 + $0x28c] ss:$16 sps:$4 sm:$0xff]  }
  0x6b   : > { %v2773_v21 = vld [vmem:[#allocation2 + $0x280] ss:$16 sps:$4 sm:$0xff]   ;;  %v2776_v22 = vld [vmem:[#allocation2 + $0x288] ss:$16 sps:$4 sm:$0xff]   ;;  %v2781_v23 = vld [vmem:[#allocation2 + $0x2a4] ss:$16 sps:$4 sm:$0xff]  }
  0x6c   : > { %1499 = vmatpush1.bf16.msra.mxu0 %v2696_v30  ;;  %1663 = vmatpush1.bf16.msra.mxu1 %v2697_v31  ;;  %v2784_v24 = vld [vmem:[#allocation2 + $0x2ac] ss:$16 sps:$4 sm:$0xff]   ;;  %v2779_v25 = vld [vmem:[#allocation2 + $0x2a0] ss:$16 sps:$4 sm:$0xff]   ;;  %v2782_v26 = vld [vmem:[#allocation2 + $0x2a8] ss:$16 sps:$4 sm:$0xff]  }
  0x6d   : > { %1500 = vmatprep.subr.bf16.mxu0 %v2698_v32  ;;  %1664 = vmatprep.subr.bf16.mxu1 %v2700_v33  ;;  %v2787_v27 = vld [vmem:[#allocation2 + $0x2c4] ss:$16 sps:$4 sm:$0xff]   ;;  %v2790_v28 = vld [vmem:[#allocation2 + $0x2cc] ss:$16 sps:$4 sm:$0xff]   ;;  %v2785_v30 = vld [vmem:[#allocation2 + $0x2c0] ss:$16 sps:$4 sm:$0xff]  }
  0x6e   : > { %v3278_v29 = vld [vmem:[%s3274_s11 + $0x8] sm:$0xff]  ;;  %v2788_v31 = vld [vmem:[#allocation2 + $0x2c8] ss:$16 sps:$4 sm:$0xff]   ;;  %v2814_v46 = vld [vmem:[#allocation2 + $0x34c] ss:$16 sps:$4 sm:$0xff]   ;;  %s2509_s7 = sshll.u32 %s3170_s22, 7 }
  0x6f   : > { %v2273_v32 = vcombine.high %v3278_v29, %v3278_v29  ;;  %v2793_v33 = vld [vmem:[#allocation2 + $0x2e4] ss:$16 sps:$4 sm:$0xff]   ;;  %v2812_v48 = vld [vmem:[#allocation2 + $0x348] ss:$16 sps:$4 sm:$0xff]   ;;  %s247_s23 = scalar_lea.vmem [#allocation7], %s2268_s15  ;;  %s3303_s30 = scalar_lea.hbm %s3350_s5, %s2509_s7 }
  0x70   : > { %1501 = vmatpush1.bf16.msra.mxu0 %v2702_v34  ;;  %1665 = vmatpush1.bf16.msra.mxu1 %v2703_v35  ;;  %v2796_v34 = vld [vmem:[#allocation2 + $0x2ec] ss:$16 sps:$4 sm:$0xff]   ;;  %v2791_v35 = vld [vmem:[#allocation2 + $0x2e0] ss:$16 sps:$4 sm:$0xff]   ;;  %s2179_s25 = sshll.u32 %s247_s23, 4  ;;  %s2166_s8 = scalar_lea.sflag [#allocation4], %s245_s14  ;;  %s3305_s25 = int_to_ptr.vmem [resolvable:$true] %s2179_s25 }
  0x71   : > { %1502 = vmatprep.subr.bf16.mxu0 %v2704_v36  ;;  %1666 = vmatprep.subr.bf16.mxu1 %v2706_v37  ;;  %v2794_v36 = vld [vmem:[#allocation2 + $0x2e8] ss:$16 sps:$4 sm:$0xff]   ;;  %v2799_v37 = vld [vmem:[#allocation2 + $0x304] ss:$16 sps:$4 sm:$0xff]   ;;  %s3039_s10 = scalar_lea.vmem %s3305_s25, 128  ;;  %p3363_p1 = scmp.ne.s32.totalorder %s3354_s28, 0 }
  0x72   : > { %p3040_p10 = scmp.ne.s32.totalorder %s3305_s25, %s3039_s10  ;;  %s3118_s22 = smov [#allocation7]  }
  0x73   : > { %s3043_s9 = sshll.u32 %s3118_s22, 4  ;;  %s3044_s9 = int_to_ptr.vmem [resolvable:$false] %s3043_s9 }
  0x74   : > { %1503 = vmatpush1.bf16.msra.mxu0 %v2708_v38  ;;  %1667 = vmatpush1.bf16.msra.mxu1 %v2709_v39  ;;  %v2802_v38 = vld [vmem:[#allocation2 + $0x30c] ss:$16 sps:$4 sm:$0xff]   ;;  %v2797_v39 = vld [vmem:[#allocation2 + $0x300] ss:$16 sps:$4 sm:$0xff]   ;;  %p3041_p2 = pnand %p3040_p10, %p3363_p1  ;;  %p3046_p4 = scmp.lt.s32.totalorder %s3305_s25, %s3044_s9 }
  0x75   : > { %1504 = vmatprep.subr.bf16.mxu0 %v2710_v40  ;;  %1668 = vmatprep.subr.bf16.mxu1 %v2712_v41  ;;  %v2800_v40 = vld [vmem:[#allocation2 + $0x308] ss:$16 sps:$4 sm:$0xff]   ;;  %v2805_v41 = vld [vmem:[#allocation2 + $0x324] ss:$16 sps:$4 sm:$0xff]  }
  0x76   : > { %p3042_p3 = pneg %p3041_p2 }
  0x78   : > { %1505 = vmatpush1.bf16.msra.mxu0 %v2714_v42  ;;  %1669 = vmatpush1.bf16.msra.mxu1 %v2715_v43  ;;  %v2808_v42 = vld [vmem:[#allocation2 + $0x32c] ss:$16 sps:$4 sm:$0xff]   ;;  %v2803_v43 = vld [vmem:[#allocation2 + $0x320] ss:$16 sps:$4 sm:$0xff]  }
  0x79   : > { %1506 = vmatprep.subr.bf16.mxu0 %v2716_v44  ;;  %1670 = vmatprep.subr.bf16.mxu1 %v2718_v45  ;;  %v2806_v44 = vld [vmem:[#allocation2 + $0x328] ss:$16 sps:$4 sm:$0xff]   ;;  %v2811_v45 = vld [vmem:[#allocation2 + $0x344] ss:$16 sps:$4 sm:$0xff]  }
  0x7c   : > { %1507 = vmatpush1.bf16.msra.mxu0 %v2720_v47  ;;  %1671 = vmatpush1.bf16.msra.mxu1 %v2721_v49  ;;  %v2809_v47 = vld [vmem:[#allocation2 + $0x340] ss:$16 sps:$4 sm:$0xff]   ;;  %v2817_v49 = vld [vmem:[#allocation2 + $0x364] ss:$16 sps:$4 sm:$0xff]  }
  0x7d   : > { %1508 = vmatprep.subr.bf16.mxu0 %v2722_v50  ;;  %1672 = vmatprep.subr.bf16.mxu1 %v2724_v51  ;;  %v2820_v50 = vld [vmem:[#allocation2 + $0x36c] ss:$16 sps:$4 sm:$0xff]   ;;  %v2815_v51 = vld [vmem:[#allocation2 + $0x360] ss:$16 sps:$4 sm:$0xff]  }
  0x80   : > { %1509 = vmatpush1.bf16.msra.mxu0 %v2726_v52  ;;  %1673 = vmatpush1.bf16.msra.mxu1 %v2727_v53  ;;  %v2818_v52 = vld [vmem:[#allocation2 + $0x368] ss:$16 sps:$4 sm:$0xff]   ;;  %v2823_v53 = vld [vmem:[#allocation2 + $0x384] ss:$16 sps:$4 sm:$0xff]  }
  0x81   : > { %1510 = vmatprep.subr.bf16.mxu0 %v2728_v54  ;;  %1674 = vmatprep.subr.bf16.mxu1 %v2730_v55  ;;  %v2826_v54 = vld [vmem:[#allocation2 + $0x38c] ss:$16 sps:$4 sm:$0xff]   ;;  %v2821_v55 = vld [vmem:[#allocation2 + $0x380] ss:$16 sps:$4 sm:$0xff]  }
  0x84   : > { %1511 = vmatpush1.bf16.msra.mxu0 %v2732_v56  ;;  %1675 = vmatpush1.bf16.msra.mxu1 %v2733_v57  ;;  %v2824_v56 = vld [vmem:[#allocation2 + $0x388] ss:$16 sps:$4 sm:$0xff]   ;;  %v2829_v57 = vld [vmem:[#allocation2 + $0x3a4] ss:$16 sps:$4 sm:$0xff]  }
  0x85   : > { %1512 = vmatprep.subr.bf16.mxu0 %v2734_v58  ;;  %1676 = vmatprep.subr.bf16.mxu1 %v2736_v59  ;;  %v2832_v58 = vld [vmem:[#allocation2 + $0x3ac] ss:$16 sps:$4 sm:$0xff]   ;;  %v2827_v59 = vld [vmem:[#allocation2 + $0x3a0] ss:$16 sps:$4 sm:$0xff]  }
  0x88   : > { %1513 = vmatpush1.bf16.msra.mxu0 %v2738_v60  ;;  %1677 = vmatpush1.bf16.msra.mxu1 %v2739_v61  ;;  %v2830_v60 = vld [vmem:[#allocation2 + $0x3a8] ss:$16 sps:$4 sm:$0xff]   ;;  %v2835_v61 = vld [vmem:[#allocation2 + $0x3c4] ss:$16 sps:$4 sm:$0xff]  }
  0x89   : > { %1514 = vmatprep.subr.bf16.mxu0 %v2740_v62  ;;  %1678 = vmatprep.subr.bf16.mxu1 %v2742_v63  ;;  %v2838_v62 = vld [vmem:[#allocation2 + $0x3cc] ss:$16 sps:$4 sm:$0xff]   ;;  %v2833_v63 = vld [vmem:[#allocation2 + $0x3c0] ss:$16 sps:$4 sm:$0xff]  }
  0x8c   : > { %1515 = vmatpush1.bf16.msra.mxu0 %v2744_v0  ;;  %1679 = vmatpush1.bf16.msra.mxu1 %v2745_v1  ;;  %v2836_v0 = vld [vmem:[#allocation2 + $0x3c8] ss:$16 sps:$4 sm:$0xff]   ;;  %v2841_v1 = vld [vmem:[#allocation2 + $0x3e4] ss:$16 sps:$4 sm:$0xff]  }
  0x8d   : > { %1525 = vmatprep.subr.bf16.mxu0 %v2751_v2  ;;  %1689 = vmatprep.subr.bf16.mxu1 %v2754_v3  ;;  %v2844_v2 = vld [vmem:[#allocation2 + $0x3ec] ss:$16 sps:$4 sm:$0xff]   ;;  %v2839_v3 = vld [vmem:[#allocation2 + $0x3e0] ss:$16 sps:$4 sm:$0xff]  }
  0x8f   : > { %1517 = vmatmul.mubr.bf16.vlgmr.msra.gmra.mrb[0].mxu0 %v2270_v4  ;;  %1681 = vmatmul.mubr.bf16.vlgmr.msra.gmra.mrb[0].mxu1 %v2270_v4  ;;  %v2842_v4 = vld [vmem:[#allocation2 + $0x3e8] ss:$16 sps:$4 sm:$0xff]  }
  0x90   : > { %1526 = vmatpush1.bf16.msra.mxu0 %v2749_v5  ;;  %1690 = vmatpush1.bf16.msra.mxu1 %v2752_v6  ;;  %v2849_v5 = vld [vmem:[#allocation2 + $0x404] ss:$16 sps:$4 sm:$0xff]   ;;  %v2852_v6 = vld [vmem:[#allocation2 + $0x40c] ss:$16 sps:$4 sm:$0xff]  }
  0x91   : > { %1527 = vmatprep.subr.bf16.mxu0 %v2757_v7  ;;  %1691 = vmatprep.subr.bf16.mxu1 %v2760_v8  ;;  %v2272_v7 = vcombine.low %v3278_v29, %v3278_v29  ;;  %v2847_v8 = vld [vmem:[#allocation2 + $0x400] ss:$16 sps:$4 sm:$0xff]   ;;  %v2882_v29 = vld [vmem:[#allocation2 + $0x4ac] ss:$16 sps:$4 sm:$0xff]  }
  0x92   : > { %1557 = vmatprep.mubr.bf16.mxu0 %v2273_v32  ;;  %1721 = vmatprep.mubr.bf16.mxu1 %v2273_v32  ;;  %v2885_v32 = vld [vmem:[#allocation2 + $0x4c4] ss:$16 sps:$4 sm:$0xff]  }
  0x94   : > { %1528 = vmatpush1.bf16.msra.mxu0 %v2755_v9  ;;  %1692 = vmatpush1.bf16.msra.mxu1 %v2758_v10  ;;  %v2850_v9 = vld [vmem:[#allocation2 + $0x408] ss:$16 sps:$4 sm:$0xff]   ;;  %v2855_v10 = vld [vmem:[#allocation2 + $0x424] ss:$16 sps:$4 sm:$0xff]  }
  0x95   : > { %1529 = vmatprep.subr.bf16.mxu0 %v2763_v11  ;;  %1693 = vmatprep.subr.bf16.mxu1 %v2766_v12  ;;  %v2858_v11 = vld [vmem:[#allocation2 + $0x42c] ss:$16 sps:$4 sm:$0xff]  }
  0x96   : > { %v3285_v12 = vld [vmem:[%s3274_s11 + $0x10] sm:$0xff] }
  0x98   : > { %1530 = vmatpush1.bf16.msra.mxu0 %v2761_v13  ;;  %1694 = vmatpush1.bf16.msra.mxu1 %v2764_v14  ;;  %v2853_v13 = vld [vmem:[#allocation2 + $0x420] ss:$16 sps:$4 sm:$0xff]   ;;  %v2275_v14 = vcombine.high %v3285_v12, %v3285_v12 }
  0x99   : > { %1531 = vmatprep.subr.bf16.mxu0 %v2769_v15  ;;  %1695 = vmatprep.subr.bf16.mxu1 %v2772_v16  ;;  %v2856_v15 = vld [vmem:[#allocation2 + $0x428] ss:$16 sps:$4 sm:$0xff]   ;;  %v2861_v16 = vld [vmem:[#allocation2 + $0x444] ss:$16 sps:$4 sm:$0xff]  }
  0x9c   : > { %1532 = vmatpush1.bf16.msra.mxu0 %v2767_v17  ;;  %1696 = vmatpush1.bf16.msra.mxu1 %v2770_v18  ;;  %v2864_v17 = vld [vmem:[#allocation2 + $0x44c] ss:$16 sps:$4 sm:$0xff]   ;;  %v2859_v18 = vld [vmem:[#allocation2 + $0x440] ss:$16 sps:$4 sm:$0xff]  }
  0x9d   : > { %1533 = vmatprep.subr.bf16.mxu0 %v2775_v19  ;;  %1697 = vmatprep.subr.bf16.mxu1 %v2778_v20  ;;  %v2862_v19 = vld [vmem:[#allocation2 + $0x448] ss:$16 sps:$4 sm:$0xff]   ;;  %v2867_v20 = vld [vmem:[#allocation2 + $0x464] ss:$16 sps:$4 sm:$0xff]  }
  0xa0   : > { %1534 = vmatpush1.bf16.msra.mxu0 %v2773_v21  ;;  %1698 = vmatpush1.bf16.msra.mxu1 %v2776_v22  ;;  %v2870_v21 = vld [vmem:[#allocation2 + $0x46c] ss:$16 sps:$4 sm:$0xff]   ;;  %v2865_v22 = vld [vmem:[#allocation2 + $0x460] ss:$16 sps:$4 sm:$0xff]  }
  0xa1   : > { %1535 = vmatprep.subr.bf16.mxu0 %v2781_v23  ;;  %1699 = vmatprep.subr.bf16.mxu1 %v2784_v24  ;;  %v2868_v23 = vld [vmem:[#allocation2 + $0x468] ss:$16 sps:$4 sm:$0xff]   ;;  %v2873_v24 = vld [vmem:[#allocation2 + $0x484] ss:$16 sps:$4 sm:$0xff]  }
  0xa4   : > { %1536 = vmatpush1.bf16.msra.mxu0 %v2779_v25  ;;  %1700 = vmatpush1.bf16.msra.mxu1 %v2782_v26  ;;  %v2876_v25 = vld [vmem:[#allocation2 + $0x48c] ss:$16 sps:$4 sm:$0xff]   ;;  %v2871_v26 = vld [vmem:[#allocation2 + $0x480] ss:$16 sps:$4 sm:$0xff]  }
  0xa5   : > { %1537 = vmatprep.subr.bf16.mxu0 %v2787_v27  ;;  %1701 = vmatprep.subr.bf16.mxu1 %v2790_v28  ;;  %v2874_v27 = vld [vmem:[#allocation2 + $0x488] ss:$16 sps:$4 sm:$0xff]   ;;  %v2879_v28 = vld [vmem:[#allocation2 + $0x4a4] ss:$16 sps:$4 sm:$0xff]  }
  0xa8   : > { %1538 = vmatpush1.bf16.msra.mxu0 %v2785_v30  ;;  %1702 = vmatpush1.bf16.msra.mxu1 %v2788_v31  ;;  %v2877_v30 = vld [vmem:[#allocation2 + $0x4a0] ss:$16 sps:$4 sm:$0xff]   ;;  %v2880_v31 = vld [vmem:[#allocation2 + $0x4a8] ss:$16 sps:$4 sm:$0xff]  }
  0xa9   : > { %1539 = vmatprep.subr.bf16.mxu0 %v2793_v33  ;;  %1703 = vmatprep.subr.bf16.mxu1 %v2796_v34  ;;  %v2888_v33 = vld [vmem:[#allocation2 + $0x4cc] ss:$16 sps:$4 sm:$0xff]   ;;  %v2883_v34 = vld [vmem:[#allocation2 + $0x4c0] ss:$16 sps:$4 sm:$0xff]  }
  0xac   : > { %1540 = vmatpush1.bf16.msra.mxu0 %v2791_v35  ;;  %1704 = vmatpush1.bf16.msra.mxu1 %v2794_v36  ;;  %v2886_v35 = vld [vmem:[#allocation2 + $0x4c8] ss:$16 sps:$4 sm:$0xff]   ;;  %v2891_v36 = vld [vmem:[#allocation2 + $0x4e4] ss:$16 sps:$4 sm:$0xff]  }
  0xad   : > { %1541 = vmatprep.subr.bf16.mxu0 %v2799_v37  ;;  %1705 = vmatprep.subr.bf16.mxu1 %v2802_v38  ;;  %v2894_v37 = vld [vmem:[#allocation2 + $0x4ec] ss:$16 sps:$4 sm:$0xff]   ;;  %v2889_v38 = vld [vmem:[#allocation2 + $0x4e0] ss:$16 sps:$4 sm:$0xff]  }
  0xb0   : > { %1542 = vmatpush1.bf16.msra.mxu0 %v2797_v39  ;;  %1706 = vmatpush1.bf16.msra.mxu1 %v2800_v40  ;;  %v2892_v39 = vld [vmem:[#allocation2 + $0x4e8] ss:$16 sps:$4 sm:$0xff]   ;;  %v2897_v40 = vld [vmem:[#allocation2 + $0x504] ss:$16 sps:$4 sm:$0xff]  }
  0xb1   : > { %1543 = vmatprep.subr.bf16.mxu0 %v2805_v41  ;;  %1707 = vmatprep.subr.bf16.mxu1 %v2808_v42  ;;  %v2900_v41 = vld [vmem:[#allocation2 + $0x50c] ss:$16 sps:$4 sm:$0xff]   ;;  %v2895_v42 = vld [vmem:[#allocation2 + $0x500] ss:$16 sps:$4 sm:$0xff]  }
  0xb4   : > { %1544 = vmatpush1.bf16.msra.mxu0 %v2803_v43  ;;  %1708 = vmatpush1.bf16.msra.mxu1 %v2806_v44  ;;  %v2898_v43 = vld [vmem:[#allocation2 + $0x508] ss:$16 sps:$4 sm:$0xff]   ;;  %v2903_v44 = vld [vmem:[#allocation2 + $0x524] ss:$16 sps:$4 sm:$0xff]  }
  0xb5   : > { %1545 = vmatprep.subr.bf16.mxu0 %v2811_v45  ;;  %1709 = vmatprep.subr.bf16.mxu1 %v2814_v46  ;;  %v2906_v45 = vld [vmem:[#allocation2 + $0x52c] ss:$16 sps:$4 sm:$0xff]   ;;  %v2901_v46 = vld [vmem:[#allocation2 + $0x520] ss:$16 sps:$4 sm:$0xff]  }
  0xb8   : > { %1546 = vmatpush1.bf16.msra.mxu0 %v2809_v47  ;;  %1710 = vmatpush1.bf16.msra.mxu1 %v2812_v48  ;;  %v2904_v47 = vld [vmem:[#allocation2 + $0x528] ss:$16 sps:$4 sm:$0xff]   ;;  %v2909_v48 = vld [vmem:[#allocation2 + $0x544] ss:$16 sps:$4 sm:$0xff]  }
  0xb9   : > { %1547 = vmatprep.subr.bf16.mxu0 %v2817_v49  ;;  %1711 = vmatprep.subr.bf16.mxu1 %v2820_v50  ;;  %v2912_v49 = vld [vmem:[#allocation2 + $0x54c] ss:$16 sps:$4 sm:$0xff]   ;;  %v2907_v50 = vld [vmem:[#allocation2 + $0x540] ss:$16 sps:$4 sm:$0xff]  }
  0xbc   : > { %1548 = vmatpush1.bf16.msra.mxu0 %v2815_v51  ;;  %1712 = vmatpush1.bf16.msra.mxu1 %v2818_v52  ;;  %v2910_v51 = vld [vmem:[#allocation2 + $0x548] ss:$16 sps:$4 sm:$0xff]   ;;  %v2915_v52 = vld [vmem:[#allocation2 + $0x564] ss:$16 sps:$4 sm:$0xff]  }
  0xbd   : > { %1549 = vmatprep.subr.bf16.mxu0 %v2823_v53  ;;  %1713 = vmatprep.subr.bf16.mxu1 %v2826_v54  ;;  %v2918_v53 = vld [vmem:[#allocation2 + $0x56c] ss:$16 sps:$4 sm:$0xff]   ;;  %v2913_v54 = vld [vmem:[#allocation2 + $0x560] ss:$16 sps:$4 sm:$0xff]  }
  0xc0   : > { %1550 = vmatpush1.bf16.msra.mxu0 %v2821_v55  ;;  %1714 = vmatpush1.bf16.msra.mxu1 %v2824_v56  ;;  %v2916_v55 = vld [vmem:[#allocation2 + $0x568] ss:$16 sps:$4 sm:$0xff]   ;;  %v2921_v56 = vld [vmem:[#allocation2 + $0x584] ss:$16 sps:$4 sm:$0xff]  }
  0xc1   : > { %1551 = vmatprep.subr.bf16.mxu0 %v2829_v57  ;;  %1715 = vmatprep.subr.bf16.mxu1 %v2832_v58  ;;  %v2924_v57 = vld [vmem:[#allocation2 + $0x58c] ss:$16 sps:$4 sm:$0xff]   ;;  %v2919_v58 = vld [vmem:[#allocation2 + $0x580] ss:$16 sps:$4 sm:$0xff]  }
  0xc4   : > { %1552 = vmatpush1.bf16.msra.mxu0 %v2827_v59  ;;  %1716 = vmatpush1.bf16.msra.mxu1 %v2830_v60  ;;  %v2922_v59 = vld [vmem:[#allocation2 + $0x588] ss:$16 sps:$4 sm:$0xff]   ;;  %v2927_v60 = vld [vmem:[#allocation2 + $0x5a4] ss:$16 sps:$4 sm:$0xff]  }
  0xc5   : > { %1553 = vmatprep.subr.bf16.mxu0 %v2835_v61  ;;  %1717 = vmatprep.subr.bf16.mxu1 %v2838_v62  ;;  %v2930_v61 = vld [vmem:[#allocation2 + $0x5ac] ss:$16 sps:$4 sm:$0xff]   ;;  %v2925_v62 = vld [vmem:[#allocation2 + $0x5a0] ss:$16 sps:$4 sm:$0xff]  }
  0xc8   : > { %1554 = vmatpush1.bf16.msra.mxu0 %v2833_v63  ;;  %1718 = vmatpush1.bf16.msra.mxu1 %v2836_v0  ;;  %v2928_v63 = vld [vmem:[#allocation2 + $0x5a8] ss:$16 sps:$4 sm:$0xff]   ;;  %v2933_v0 = vld [vmem:[#allocation2 + $0x5c4] ss:$16 sps:$4 sm:$0xff]  }
  0xc9   : > { %1555 = vmatprep.subr.bf16.mxu0 %v2841_v1  ;;  %1719 = vmatprep.subr.bf16.mxu1 %v2844_v2  ;;  %v2936_v1 = vld [vmem:[#allocation2 + $0x5cc] ss:$16 sps:$4 sm:$0xff]   ;;  %v2931_v2 = vld [vmem:[#allocation2 + $0x5c0] ss:$16 sps:$4 sm:$0xff]  }
  0xcc   : > { %1556 = vmatpush1.bf16.msra.mxu0 %v2839_v3  ;;  %1720 = vmatpush1.bf16.msra.mxu1 %v2842_v4  ;;  %v2934_v3 = vld [vmem:[#allocation2 + $0x5c8] ss:$16 sps:$4 sm:$0xff]   ;;  %v2939_v4 = vld [vmem:[#allocation2 + $0x5e4] ss:$16 sps:$4 sm:$0xff]  }
  0xcd   : > { %1566 = vmatprep.subr.bf16.mxu0 %v2849_v5  ;;  %1730 = vmatprep.subr.bf16.mxu1 %v2852_v6  ;;  %v2942_v5 = vld [vmem:[#allocation2 + $0x5ec] ss:$16 sps:$4 sm:$0xff]   ;;  %v2937_v6 = vld [vmem:[#allocation2 + $0x5e0] ss:$16 sps:$4 sm:$0xff]  }
  0xcf   : > { %1558 = vmatmul.mubr.bf16.vlgmr.msra.gmra.mrb[0].mxu0 %v2272_v7  ;;  %1722 = vmatmul.mubr.bf16.vlgmr.msra.gmra.mrb[0].mxu1 %v2272_v7  ;;  %v2940_v7 = vld [vmem:[#allocation2 + $0x5e8] ss:$16 sps:$4 sm:$0xff]  }
  0xd0   : > { %1567 = vmatpush1.bf16.msra.mxu0 %v2847_v8  ;;  %1731 = vmatpush1.bf16.msra.mxu1 %v2850_v9  ;;  %v2947_v8 = vld [vmem:[#allocation2 + $0x604] ss:$16 sps:$4 sm:$0xff]   ;;  %v2950_v9 = vld [vmem:[#allocation2 + $0x60c] ss:$16 sps:$4 sm:$0xff]  }
  0xd1   : > { %1568 = vmatprep.subr.bf16.mxu0 %v2855_v10  ;;  %1732 = vmatprep.subr.bf16.mxu1 %v2858_v11  ;;  %v2274_v10 = vcombine.low %v3285_v12, %v3285_v12  ;;  %v2945_v11 = vld [vmem:[#allocation2 + $0x600] ss:$16 sps:$4 sm:$0xff]  }
  0xd2   : > { %1598 = vmatprep.mubr.bf16.mxu0 %v2275_v14  ;;  %1762 = vmatprep.mubr.bf16.mxu1 %v2275_v14  ;;  %v2951_v14 = vld [vmem:[#allocation5 + $0x40] sm:$0xff]  }
  0xd3   : > { %v2953_v12 = vld [vmem:[#allocation5] sm:$0xff]  }
  0xd4   : > { %1569 = vmatpush1.bf16.msra.mxu0 %v2853_v13  ;;  %1733 = vmatpush1.bf16.msra.mxu1 %v2856_v15  ;;  %v2948_v13 = vld [vmem:[#allocation2 + $0x608] ss:$16 sps:$4 sm:$0xff]   ;;  %v2952_v15 = vld [vmem:[#allocation5 + $0xc0] sm:$0xff]  }
  0xd5   : > { %1570 = vmatprep.subr.bf16.mxu0 %v2861_v16  ;;  %1734 = vmatprep.subr.bf16.mxu1 %v2864_v17  ;;  %v3117_v16 = vmov 0   ;;  %v2748_v17 = vld [vmem:[%s3274_s11 + $0x18] ss:$0 sps:$4 sm:$0xff]   ;;  %s3045_s11 = scalar_lea.vmem %s3044_s9, 256 }
  0xd6   : > { %p3047_p7 = scmp.lt.s32.totalorder %s3045_s11, %s3039_s10 }
  0xd8   : > { %1571 = vmatpush1.bf16.msra.mxu0 %v2859_v18  ;;  %1735 = vmatpush1.bf16.msra.mxu1 %v2862_v19  ;;  %v2954_v18 = vld [vmem:[#allocation5 + $0x80] sm:$0xff]   ;;  %v2955_v19 = vld [vmem:[#allocation5 + $0x48] sm:$0xff]   ;;  %p3048_p8 = por %p3047_p7, %p3046_p4 }
  0xd9   : > { %1572 = vmatprep.subr.bf16.mxu0 %v2867_v20  ;;  %1736 = vmatprep.subr.bf16.mxu1 %v2870_v21  ;;  %v2956_v20 = vld [vmem:[#allocation5 + $0xc8] sm:$0xff]  }
  0xda   : > { %v2957_v21 = vld [vmem:[#allocation5 + $0x8] sm:$0xff]   ;;  %p3049_p11 = pnand %p3048_p8, %p3042_p3 }
  0xdc   : > { %1573 = vmatpush1.bf16.msra.mxu0 %v2865_v22  ;;  %1737 = vmatpush1.bf16.msra.mxu1 %v2868_v23  ;;  %v2958_v22 = vld [vmem:[#allocation5 + $0x88] sm:$0xff]   ;;  %v2959_v23 = vld [vmem:[#allocation5 + $0x50] sm:$0xff]  }
  0xdd   : > { %1574 = vmatprep.subr.bf16.mxu0 %v2873_v24  ;;  %1738 = vmatprep.subr.bf16.mxu1 %v2876_v25  ;;  %v2960_v24 = vld [vmem:[#allocation5 + $0xd0] sm:$0xff]  }
  0xde   : > { %v2961_v25 = vld [vmem:[#allocation5 + $0x10] sm:$0xff]  }
  0xe0   : > { %1575 = vmatpush1.bf16.msra.mxu0 %v2871_v26  ;;  %1739 = vmatpush1.bf16.msra.mxu1 %v2874_v27  ;;  %v2962_v26 = vld [vmem:[#allocation5 + $0x90] sm:$0xff]   ;;  %v2963_v27 = vld [vmem:[#allocation5 + $0x58] sm:$0xff]  }
  0xe1   : > { %1576 = vmatprep.subr.bf16.mxu0 %v2879_v28  ;;  %1740 = vmatprep.subr.bf16.mxu1 %v2882_v29  ;;  %v2964_v28 = vld [vmem:[#allocation5 + $0xd8] sm:$0xff]  }
  0xe2   : > { %v2965_v29 = vld [vmem:[#allocation5 + $0x18] sm:$0xff]  }
  0xe4   : > { %1577 = vmatpush1.bf16.msra.mxu0 %v2877_v30  ;;  %1741 = vmatpush1.bf16.msra.mxu1 %v2880_v31  ;;  %v2966_v30 = vld [vmem:[#allocation5 + $0x98] sm:$0xff]   ;;  %v2967_v31 = vld [vmem:[#allocation5 + $0x60] sm:$0xff]  }
  0xe5   : > { %1578 = vmatprep.subr.bf16.mxu0 %v2885_v32  ;;  %1742 = vmatprep.subr.bf16.mxu1 %v2888_v33  ;;  %v2968_v32 = vld [vmem:[#allocation5 + $0xe0] sm:$0xff]  }
  0xe6   : > { %v2969_v33 = vld [vmem:[#allocation5 + $0x20] sm:$0xff]  }
  0xe8   : > { %1579 = vmatpush1.bf16.msra.mxu0 %v2883_v34  ;;  %1743 = vmatpush1.bf16.msra.mxu1 %v2886_v35  ;;  %v2970_v34 = vld [vmem:[#allocation5 + $0xa0] sm:$0xff]   ;;  %v2971_v35 = vld [vmem:[#allocation5 + $0x68] sm:$0xff]  }
  0xe9   : > { %1580 = vmatprep.subr.bf16.mxu0 %v2891_v36  ;;  %1744 = vmatprep.subr.bf16.mxu1 %v2894_v37  ;;  %v2972_v36 = vld [vmem:[#allocation5 + $0xe8] sm:$0xff]  }
  0xea   : > { %v2973_v37 = vld [vmem:[#allocation5 + $0x28] sm:$0xff]  }
  0xec   : > { %1581 = vmatpush1.bf16.msra.mxu0 %v2889_v38  ;;  %1745 = vmatpush1.bf16.msra.mxu1 %v2892_v39  ;;  %v2974_v38 = vld [vmem:[#allocation5 + $0xa8] sm:$0xff]   ;;  %v2975_v39 = vld [vmem:[#allocation5 + $0x70] sm:$0xff]  }
  0xed   : > { %1582 = vmatprep.subr.bf16.mxu0 %v2897_v40  ;;  %1746 = vmatprep.subr.bf16.mxu1 %v2900_v41  ;;  %v2976_v40 = vld [vmem:[#allocation5 + $0xf0] sm:$0xff]  }
  0xee   : > { %v2977_v41 = vld [vmem:[#allocation5 + $0x30] sm:$0xff]  }
  0xf0   : > { %1583 = vmatpush1.bf16.msra.mxu0 %v2895_v42  ;;  %1747 = vmatpush1.bf16.msra.mxu1 %v2898_v43  ;;  %v2978_v42 = vld [vmem:[#allocation5 + $0xb0] sm:$0xff]   ;;  %v2979_v43 = vld [vmem:[#allocation5 + $0x78] sm:$0xff]  }
  0xf1   : > { %1584 = vmatprep.subr.bf16.mxu0 %v2903_v44  ;;  %1748 = vmatprep.subr.bf16.mxu1 %v2906_v45  ;;  %v2980_v44 = vld [vmem:[#allocation5 + $0xf8] sm:$0xff]  }
  0xf2   : > { %v2981_v45 = vld [vmem:[#allocation5 + $0x38] sm:$0xff]  }
  0xf4   : > { %1585 = vmatpush1.bf16.msra.mxu0 %v2901_v46  ;;  %1749 = vmatpush1.bf16.msra.mxu1 %v2904_v47  ;;  %v2982_v46 = vld [vmem:[#allocation5 + $0xb8] sm:$0xff]   ;;  %v456_v47 = vlaneseq }
  0xf5   : > { %1586 = vmatprep.subr.bf16.mxu0 %v2909_v48  ;;  %1750 = vmatprep.subr.bf16.mxu1 %v2912_v49 }
  0xf6   : > { %v457_v48 = vshrl.u32 %v456_v47, 7 }
  0xf8   : > { %1587 = vmatpush1.bf16.msra.mxu0 %v2907_v50  ;;  %1751 = vmatpush1.bf16.msra.mxu1 %v2910_v51  ;;  %v458_v49 = vsub.s32 0, %v457_v48  ;;  %v466_v50 = vsub.s32 2, %v457_v48  ;;  %v454_v51 = vld [vmem:[%s3347_s2] sm:$0xf] }
  0xf9   : > { %1588 = vmatprep.subr.bf16.mxu0 %v2915_v52  ;;  %1752 = vmatprep.subr.bf16.mxu1 %v2918_v53  ;;  %v462_v52 = vsub.s32 1, %v457_v48  ;;  %v470_v53 = vsub.s32 3, %v457_v48 }
  0xfc   : > { %1589 = vmatpush1.bf16.msra.mxu0 %v2913_v54  ;;  %1753 = vmatpush1.bf16.msra.mxu1 %v2916_v55  ;;  %v459_v54 = vrot.slane %v454_v51, %v458_v49  ;;  %v467_v55 = vrot.slane %v454_v51, %v466_v50 }
  0xfd   : > { %1590 = vmatprep.subr.bf16.mxu0 %v2921_v56  ;;  %1754 = vmatprep.subr.bf16.mxu1 %v2924_v57  ;;  %v463_v56 = vrot.slane %v454_v51, %v462_v52  ;;  %v471_v57 = vrot.slane %v454_v51, %v470_v53 }
 0x100   : > { %1591 = vmatpush1.bf16.msra.mxu0 %v2919_v58  ;;  %1755 = vmatpush1.bf16.msra.mxu1 %v2922_v59 }
 0x101   : > { %1592 = vmatprep.subr.bf16.mxu0 %v2927_v60  ;;  %1756 = vmatprep.subr.bf16.mxu1 %v2930_v61 }
 0x104   : > { %1593 = vmatpush1.bf16.msra.mxu0 %v2925_v62  ;;  %1757 = vmatpush1.bf16.msra.mxu1 %v2928_v63 }
 0x105   : > { %1594 = vmatprep.subr.bf16.mxu0 %v2933_v0  ;;  %1758 = vmatprep.subr.bf16.mxu1 %v2936_v1 }
 0x108   : > { %1595 = vmatpush1.bf16.msra.mxu0 %v2931_v2  ;;  %1759 = vmatpush1.bf16.msra.mxu1 %v2934_v3 }
 0x109   : > { %1596 = vmatprep.subr.bf16.mxu0 %v2939_v4  ;;  %1760 = vmatprep.subr.bf16.mxu1 %v2942_v5 }
 0x10c   : > { %1597 = vmatpush1.bf16.msra.mxu0 %v2937_v6  ;;  %1761 = vmatpush1.bf16.msra.mxu1 %v2940_v7 }
 0x10d   : > { %1607 = vmatprep.subr.bf16.mxu0 %v2947_v8  ;;  %1771 = vmatprep.subr.bf16.mxu1 %v2950_v9 }
 0x10f   : > { %1599 = vmatmul.mubr.bf16.vlgmr.msra.gmra.mrb[0].mxu0 %v2274_v10  ;;  %1763 = vmatmul.mubr.bf16.vlgmr.msra.gmra.mrb[0].mxu1 %v2274_v10 }
 0x110   : > { %1608 = vmatpush1.bf16.msra.mxu0 %v2945_v11  ;;  %1772 = vmatpush1.bf16.msra.mxu1 %v2948_v13 }
 0x111   : > { %1639 = vmatprep.mubr.bf16.mxu0 %v3117_v16  ;;  %1803 = vmatprep.mubr.bf16.mxu1 %v3117_v16 }
 0x112   : > { %2512 = vmatprep.subr.bf16.mxu0 %v2951_v14  ;;  %2534 = vmatprep.subr.bf16.mxu1 %v2952_v15 }
 0x11b   : > { %2473 = vmatmul.mubr.msk.bf16.vlgmr.msra.gmra.mrb[0].mxu0 %vm1480_vm0, %v2748_v17  ;;  %2474 = vmatmul.mubr.msk.bf16.vlgmr.msra.gmra.mrb[0].mxu1 %vm1480_vm0, %v2748_v17  ;;  %v2475_v17 = vld [vmem:[%s3349_s4] ss:$0 sm:$0xff] }
 0x11c   : > { %2513 = vmatpush3.bf16.msra.mxu0 %v2953_v12  ;;  %2535 = vmatpush3.bf16.msra.mxu1 %v2954_v18 }
 0x11d   : > { %2514 = vmatprep.subr.bf16.mxu0 %v2955_v19  ;;  %2536 = vmatprep.subr.bf16.mxu1 %v2956_v20 }
 0x120   : > { %2515 = vmatpush3.bf16.msra.mxu0 %v2957_v21  ;;  %2537 = vmatpush3.bf16.msra.mxu1 %v2958_v22 }
 0x121   : > { %2516 = vmatprep.subr.bf16.mxu0 %v2959_v23  ;;  %2538 = vmatprep.subr.bf16.mxu1 %v2960_v24 }
 0x124   : > { %2517 = vmatpush3.bf16.msra.mxu0 %v2961_v25  ;;  %2539 = vmatpush3.bf16.msra.mxu1 %v2962_v26 }
 0x125   : > { %2518 = vmatprep.subr.bf16.mxu0 %v2963_v27  ;;  %2540 = vmatprep.subr.bf16.mxu1 %v2964_v28 }
 0x128   : > { %2519 = vmatpush3.bf16.msra.mxu0 %v2965_v29  ;;  %2541 = vmatpush3.bf16.msra.mxu1 %v2966_v30 }
 0x129   : > { %2520 = vmatprep.subr.bf16.mxu0 %v2967_v31  ;;  %2542 = vmatprep.subr.bf16.mxu1 %v2968_v32 }
 0x12c   : > { %2521 = vmatpush3.bf16.msra.mxu0 %v2969_v33  ;;  %2543 = vmatpush3.bf16.msra.mxu1 %v2970_v34 }
 0x12d   : > { %2522 = vmatprep.subr.bf16.mxu0 %v2971_v35  ;;  %2544 = vmatprep.subr.bf16.mxu1 %v2972_v36 }
 0x130   : > { %2523 = vmatpush3.bf16.msra.mxu0 %v2973_v37  ;;  %2545 = vmatpush3.bf16.msra.mxu1 %v2974_v38 }
 0x131   : > { %2524 = vmatprep.subr.bf16.mxu0 %v2975_v39  ;;  %2546 = vmatprep.subr.bf16.mxu1 %v2976_v40 }
 0x134   : > { %2525 = vmatpush3.bf16.msra.mxu0 %v2977_v41  ;;  %2547 = vmatpush3.bf16.msra.mxu1 %v2978_v42 }
 0x135   : > { %2526 = vmatprep.subr.bf16.mxu0 %v2979_v43  ;;  %2548 = vmatprep.subr.bf16.mxu1 %v2980_v44 }
 0x138   : > { %2527 = vmatpush3.bf16.msra.mxu0 %v2981_v45  ;;  %2549 = vmatpush3.bf16.msra.mxu1 %v2982_v46 }
 0x1ee   : > { %v1641_v58 = vpop.f32.mrb[0].mxu0  ;;  %v1805_v59 = vpop.f32.mrb[0].mxu1 }
 0x1ef   : > { %v2556_v60 = vadd.f32 %v1641_v58, %v459_v54  ;;  %v2558_v61 = vadd.f32 %v1805_v59, %v467_v55  ;;  %v1643_v62 = vpop.f32.mrb[1].mxu0  ;;  %v1807_v63 = vpop.f32.mrb[1].mxu1 }
 0x1f0   : > { %v2557_v0 = vadd.f32 %v1643_v62, %v463_v56  ;;  %v2559_v1 = vadd.f32 %v1807_v63, %v471_v57  ;;  %v1645_v2 = vpop.f32.mrb[2].mxu0  ;;  %v1809_v3 = vpop.f32.mrb[2].mxu1 }
 0x1f1   : > { %v1812_v4 = vmax.f32 %v2556_v60, 0.0  ;;  %v1814_v5 = vmax.f32 %v2558_v61, 0.0  ;;  %v1646_v6 = vpop.f32.mrb[3].mxu0  ;;  %v1810_v7 = vpop.f32.mrb[3].mxu1 }
 0x1f2   : > { %v1813_v8 = vmax.f32 %v2557_v0, 0.0  ;;  %v1815_v9 = vmax.f32 %v2559_v1, 0.0 }
 0x1f3   : > { %v1816_v13 = vpack.c.bf16 %v1812_v4, %v1812_v4  ;;  %v1818_v14 = vpack.c.bf16 %v1814_v5, %v1814_v5 }
 0x1f4   : > { %v1817_v10 = vpack.c.bf16 %v1813_v8, %v1813_v8  ;;  %v1819_v11 = vpack.c.bf16 %v1815_v9, %v1815_v9 }
 0x1f6   : > { %2115 = vmatprep.mubr.bf16.mxu0 %v1817_v10  ;;  %2155 = vmatprep.mubr.bf16.mxu1 %v1819_v11 }
 0x1f7   : > { %2116 = vmatmul.mubr.bf16.vlgmr.msra.gmra.mrb[4].mxu0 %v1816_v13  ;;  %2156 = vmatmul.mubr.bf16.vlgmr.msra.gmra.mrb[4].mxu1 %v1818_v14 }
 0x2ca   : > { %v2528_v15 = vpop.f32.mrb[4].mxu0  ;;  %v2550_v16 = vpop.f32.mrb[4].mxu1 }
 0x2cb   : > { %v2529_v12 = vpop.f32.mrb[5].mxu0  ;;  %v2551_v18 = vpop.f32.mrb[5].mxu1 }
 0x2cc   : > { %v2530_v19 = vadd.f32 %v2529_v12, %v2528_v15  ;;  %v2552_v20 = vadd.f32 %v2551_v18, %v2550_v16  ;;  %v2531_v21 = vpop.f32.mrb[6].mxu0  ;;  %v2553_v22 = vpop.f32.mrb[6].mxu1 }
 0x2cd   : > { %v2532_v23 = vpop.f32.mrb[7].mxu0  ;;  %v2554_v24 = vpop.f32.mrb[7].mxu1 }
 0x2ce   : > { %v2118_v25 = vadd.f32 %v2530_v19, %v2475_v17 }
 0x2d0   : > { %v2158_v26 = vadd.f32 %v2552_v20, %v2118_v25 }
 0x2d2   : > { %v2163_v27 = vmax.f32 %v2158_v26, 0.0 }
 0x2d4   : > { %2164 = vst [vmem:[%s247_s23] sm:$0xff] %v2163_v27 }
 0x2d5   : > { %3052 = shalt.err (!%p3049_p11)
}
 0x2d6   : > { %s3053_s12 = scalar_lea.hbm %s3303_s30, 128  ;;  %s3057_s15 = scalar_lea.hbm %s3350_s5, 256 }
 0x2d7   : > { %p3054_p13 = scmp.ne.s32.totalorder %s3303_s30, %s3053_s12  ;;  %p3058_p6 = scmp.lt.u32.totalorder %s3303_s30, %s3350_s5 }
 0x2d8   : > { %p3059_p9 = scmp.lt.u32.totalorder %s3057_s15, %s3053_s12  ;;  %p3061_p10 = scmp.lt.u32.totalorder %s3053_s12, %s3303_s30 }
 0x2d9   : > { %p3055_p0 = pnand %p3054_p13, %p3363_p1 }
 0x2da   : > { %p3060_p12 = por %p3059_p9, %p3058_p6 }
 0x2db   : > { %p3056_p5 = pneg %p3055_p0 }
 0x2dc   : > { %p3062_p2 = por %p3061_p10, %p3060_p12 }
 0x2de   : > { %p3063_p3 = pnand %p3062_p2, %p3056_p5 }
 0x2e0   : > { %3066 = shalt.err (!%p3063_p3)
}
 0x2e1   : > { %2593 = dma.vmem_to_hbm [thread:$0]  (%p3363_p1), %s3305_s25, 128, %s3303_s30, %s2166_s8  }
 0x2e2 PF: > { %p2610_p4 = scmp.ge.s32.totalorder %s3109_s21, 2  ;;  %s2191_s7 = sand.u32 1, %s3097_s18  }
 0x2e3   : > { %p3364_p7 = scmp.ne.s32.totalorder %s3355_s29, 0  ;;  %s2192_s23 = scalar_lea.sflag [#allocation4], %s2191_s7 }
 0x2e5   : > { %p2603_p8 = pnand %p2610_p4, %p3364_p7 }
 0x2e7   : > { %3092 = dma.done.wait (!%p2603_p8), %s2192_s23, 128  }
 0x2e8   : > { %3094 = vsyncadd (!%p2603_p8), %s2192_s23, 4294967168  ;;  %p17_p11 = scmp.ge.s32.totalorder %s3174_s24, 4   ;;  %s3365_s18 = smov %s3101_s19 }
 0x2e9   : > { %s3366_s19 = smov %s3105_s20  ;;  %s3367_s20 = smov %s3185_s27 }
 0x2ea   : > { %s3368_s21 = smov %s3174_s24  ;;  %19 = sbr.rel (!%p17_p11) target bundleno = 5 (0x5), region = 84 }
 0x2f1   :  { %2197 = vsyncpa [#allocation3], 1 }
 0x2f2   :  { %2199 = vsyncpa [#allocation3 + $0x1], 1 }
 0x2f3   :  { %2200 = vsyncpa [#allocation6], 1 }
 0x2f4   :  { %2201 = vsyncpa [#allocation4], 1 }
 0x2f5   :  { %2203 = vsyncpa [#allocation4 + $0x1], 1 }

</bundles_post_ra>
